<compile_context>
chip_gen: v7x
topology: tpu7x:2x2x1
jax: 0.10.0
libtpu: 0.0.40
codegen_flags: <defaults>
</compile_context>

<pallas_src>
import math

import jax
import jax.numpy as jnp
from jax.experimental import pallas as pl
from jax.experimental.pallas import tpu as pltpu


_LANE = 128
_MAX_LANES = 4096                       # cap lane width of the flattened view
_SUBLANE_BY_ITEMSIZE = {4: 8, 2: 16, 1: 32}


def _compute_tile_bytes():
    """Per-generation byte budget for one block (input tile == output tile)."""
    try:
        vmem = pltpu.get_tpu_info().vmem_capacity_bytes
        if vmem is not None and vmem <= 64 * 1024 * 1024:
            # v7x-class core: 64 MiB VMEM / 32 MiB default scoped; 4 buffers x
            # 4 MiB = 16 MiB leaves plenty of headroom and halves grid steps.
            return 4 * 1024 * 1024
    except Exception:
        pass
    # v5e/v6e (or unknown): 2 MiB tiles sit on the >=85% HBM-roofline plateau
    # and keep 4 x 2 MiB = 8 MiB under v5e's 16 MiB default scoped budget.
    return 2 * 1024 * 1024


_TARGET_TILE_BYTES = _compute_tile_bytes()


def _temp_scale_kernel(temp_ref, x_ref, o_ref):
    # temp_ref: (1,) f32 scalar in SMEM; x_ref/o_ref: (block_rows, lanes) VMEM tile.
    inv = 1.0 / temp_ref[0]                      # exact scalar reciprocal, scalar unit
    o_ref[...] = (x_ref[...] * inv).astype(o_ref.dtype)


def _pick_lanes(total):
    """Largest lane width (multiple of 128, <= 4096) that exactly divides total."""
    if total < _LANE or total % _LANE != 0:
        return None
    start = min(_MAX_LANES, total)               # both are multiples of 128 here
    for cand in range(start, _LANE - 1, -_LANE):
        if total % cand == 0:
            return cand
    return _LANE


def _pick_block_rows(rows, lanes, itemsize, tile_bytes):
    """Row-block size: ~tile_bytes per block, dtype-correct sublane multiple,
    and >= 2 blocks when possible (v7x megacore sharding of the parallel axis)."""
    sub = _SUBLANE_BY_ITEMSIZE.get(itemsize, 8)
    row_bytes = lanes * itemsize
    br = max(sub, (tile_bytes // row_bytes) // sub * sub)
    if br > rows:                                # don't over-allocate past the array
        br = max(sub, pl.cdiv(rows, sub) * sub)
    while pl.cdiv(rows, br) < 2 and br > sub:    # allow 2-way TC sharding on v7x
        br = max(sub, (br // 2) // sub * sub)
    return br


def _scale_2d(x2d, temp1, block_rows):
    rows, lanes = x2d.shape
    grid = (pl.cdiv(rows, block_rows),)          # ragged last block masked by Pallas
    return pl.pallas_call(
        _temp_scale_kernel,
        out_shape=jax.ShapeDtypeStruct((rows, lanes), x2d.dtype),
        grid=grid,
        in_specs=[
            pl.BlockSpec(memory_space=pltpu.MemorySpace.SMEM),     # temperature (1,)
            pl.BlockSpec((block_rows, lanes), lambda i: (i, 0)),   # logits tile
        ],
        out_specs=pl.BlockSpec((block_rows, lanes), lambda i: (i, 0)),
        compiler_params=pltpu.CompilerParams(
            dimension_semantics=("parallel",),   # lets v7x shard rows over 2 TCs
        ),
    )(temp1, x2d)


@jax.jit
def temperature_scale(logits, temperature):
    """TemperatureScaler.forward: logits / temperature (scalar), via Pallas."""
    orig_shape = logits.shape
    total = math.prod(orig_shape) if orig_shape else 1
    if total == 0:
        return logits

    temp1 = jnp.reshape(temperature, (1,)).astype(jnp.float32)   # accepts 0-d or (1,)
    itemsize = jnp.dtype(logits.dtype).itemsize

    lanes = _pick_lanes(total)
    if lanes is not None:
        # Pad-free path: free reshape to a lane-dense (rows, lanes) view.
        rows = total // lanes
        block_rows = _pick_block_rows(rows, lanes, itemsize, _TARGET_TILE_BYTES)
        out2d = _scale_2d(logits.reshape(rows, lanes), temp1, block_rows)
        return out2d.reshape(orig_shape)

    # Fallback for awkward sizes (numel % 128 != 0): minimal pad (< 128 elems,
    # but jnp.pad/slice each cost an extra HBM pass, so only used here).
    # TODO(synk): a masked 1-D tail block could remove even this fallback.
    lanes = _LANE
    rows = pl.cdiv(total, lanes)
    pad = rows * lanes - total
    flat = jnp.pad(logits.reshape(-1), (0, pad))
    block_rows = _pick_block_rows(rows, lanes, itemsize, _TARGET_TILE_BYTES)
    out2d = _scale_2d(flat.reshape(rows, lanes), temp1, block_rows)
    return out2d.reshape(-1)[:total].reshape(orig_shape)


if __name__ == "__main__":
    key = jax.random.PRNGKey(0)
    k1, k2, k3 = jax.random.split(key, 3)

    # Parameter init matches nn.Parameter(torch.ones(1)); plus a fitted-looking value.
    temperature_init = jnp.ones((1,), dtype=jnp.float32)
    temperature_fit = jnp.full((1,), 1.5, dtype=jnp.float32)
    # TODO(synk): the LBFGS-based `fit` (optimizer loop) is training logic, not a
    # kernel; only the forward pass is implemented here.

    cases = [
        ("awkward f32 [16,10]", jax.random.normal(k1, (16, 10), jnp.float32)),
        ("lane-dense f32 [8,128]", jax.random.normal(k2, (8, 128), jnp.float32)),
        ("lane-dense bf16 [4,8,32]",
         jax.random.normal(k3, (4, 8, 32), jnp.float32).astype(jnp.bfloat16)),
    ]

    for name, logits in cases:
        for temp in (temperature_init, temperature_fit):
            out = jax.block_until_ready(temperature_scale(logits, temp))
            assert out.shape == logits.shape and out.dtype == logits.dtype, name
            ref = (logits.astype(jnp.float32) / temp[0]).astype(logits.dtype)
            tol = 1e-6 if logits.dtype == jnp.float32 else 2e-2
            assert jnp.allclose(out.astype(jnp.float32), ref.astype(jnp.float32),
                                atol=tol, rtol=tol), name

    print("KERNEL_OK")
</pallas_src>

<mosaic_0001>
module attributes {stable_mosaic.version = 11 : i64} {
  func.func @_temp_scale_kernel(%arg0: i32, %arg1: memref<1xf32, #tpu.memory_space<smem>>, %arg2: memref<8x128xf32, #tpu.memory_space<vmem>>, %arg3: memref<8x128xf32, #tpu.memory_space<vmem>>) attributes {dimension_semantics = [#tpu.dimension_semantics<parallel>], iteration_bounds = array<i64: 1>, scalar_prefetch = 0 : i64, scratch_operands = 0 : i64, tpu.core_type = #tpu.core_type<tc>, window_params = [{transform_indices = @transform_0, window_bounds = array<i64: 1>}, {transform_indices = @transform_1, window_bounds = array<i64: 8, 128>}, {transform_indices = @transform_2, window_bounds = array<i64: 8, 128>}]} {
    %c0 = arith.constant 0 : index
    %0 = memref.load %arg1[%c0] : memref<1xf32, #tpu.memory_space<smem>>
    %cst = arith.constant 1.000000e+00 : f32
    %1 = arith.divf %cst, %0 : f32
    %c0_0 = arith.constant 0 : index
    %c0_1 = arith.constant 0 : index
    %2 = vector.load %arg2[%c0_0, %c0_1] : memref<8x128xf32, #tpu.memory_space<vmem>>, vector<8x128xf32>
    %3 = vector.broadcast %1 : f32 to vector<8x128xf32>
    %4 = arith.mulf %2, %3 : vector<8x128xf32>
    %c0_2 = arith.constant 0 : index
    %c0_3 = arith.constant 0 : index
    %5 = vector.load %arg3[%c0_2, %c0_3] : memref<8x128xf32, #tpu.memory_space<vmem>>, vector<8x128xf32>
    tpu.vector_store %arg3[%c0_2, %c0_3], %4 {strides = array<i32>} : memref<8x128xf32, #tpu.memory_space<vmem>>, vector<8x128xf32>,
    return
  }
  func.func @transform_0(%arg0: i32) -> i32 {
    %c0_i32 = arith.constant 0 : i32
    %c0_i32_0 = arith.constant 0 : i32
    return %c0_i32 : i32
  }
  func.func @transform_1(%arg0: i32) -> (i32, i32) {
    %c0_i32 = arith.constant 0 : i32
    %c0_i32_0 = arith.constant 0 : i32
    return %arg0, %c0_i32 : i32, i32
  }
  func.func @transform_2(%arg0: i32) -> (i32, i32) {
    %c0_i32 = arith.constant 0 : i32
    %c0_i32_0 = arith.constant 0 : i32
    return %arg0, %c0_i32 : i32, i32
  }
}

</mosaic_0001>

<bundles_post_ra>
// kernel: temperature_scale.1
= control target key start
LH: loop header
LB: loop body
LE: loop exit
PB: predicated region body
PF: predicated region fallthrough
CT: control target
= control target key end

     0   :  { %s87_s0 = inlined_call_operand.<no memory space> [shape: f32[1], index: 0, kind: input, shape index: {}]   ;;  %s88_s1 = inlined_call_operand.vmem [shape: f32[2,128], index: 1, kind: input, shape index: {}]   ;;  %s89_s2 = inlined_call_operand.vmem [shape: f32[2,128], index: 2, kind: output, shape index: {}]  }
   0x1   :  { %v13_v0 = vstv %s87_s0  ;;  %v16_v2 = vld [vmem:[%s88_s1] sm:$0xff] }
   0x2   :  { %61 = vrcp.f32 %v13_v0 }
   0xc   :  { %v62_v1 = vpop.eup %61 }
   0xd   :  { %59 = vpush %v62_v1 }
  0x3e   :  { %s60_s13 = spop %59 }
  0x3f   :  { %v17_v3 = vstv %s60_s13 }
  0x40   :  { %v18_v4 = vmul.f32 %v17_v3, %v16_v2 }
  0x42   :  { %19 = vst [vmem:[#allocation3] sm:$0xff] %v18_v4 }
  0x49   :  { %v37_v5 = vld [vmem:[#allocation3] sm:$0x3] }
  0x4a   :  { %38 = vst [vmem:[%s89_s2] sm:$0x3] %v37_v5 }

</bundles_post_ra>
